<compile_context>
chip_gen: v7x
topology: tpu7x:2x2x1
jax: 0.10.0
libtpu: 0.0.40
codegen_flags: <defaults>
</compile_context>

<pallas_src>
import functools

import jax
import jax.numpy as jnp
from jax.experimental import pallas as pl
from jax.experimental.pallas import tpu as pltpu


def _device_kind():
    try:
        return jax.devices()[0].device_kind.lower()
    except Exception:
        return ""


def _num_tensorcores():
    # v7x (and megacore v4/v5p) expose 2 TensorCores that the "parallel" grid
    # axis can shard across; v5e/v6e have a single TC, where splitting would
    # only serialize and fragment the column stream, so keep n_split = 1.
    kind = _device_kind()
    return 2 if ("v7" in kind or "v4" in kind or "v5p" in kind) else 1


def _default_tile_n():
    # HBM-streaming kernel (~72 B of pred + 4 B of target per column).  Use a
    # tile wide enough that each grid step moves multiple MB so the per-step
    # overhead is <20% of the HBM time.  VMEM (double-buffered, sublane-padded)
    # is ~10 MiB at 32K and ~17 MiB at 64K: under every generation's scoped
    # VMEM default (16 MiB v5e, 32 MiB v6e/v7x), so no vmem_limit override.
    return 65536 if "v7" in _device_kind() else 32768


def _label_smoothing_kernel(pred_ref, tgt_ref, out_ref, *,
                            confidence, smooth_val, num_classes, total_n, tile_n):
    p = pl.program_id(0)          # partial / TensorCore split (parallel)
    j = pl.program_id(1)          # column-tile step (reduction, arbitrary)
    steps = pl.num_programs(1)

    @pl.when(j == 0)
    def _():
        out_ref[...] = jnp.zeros_like(out_ref)

    x = pred_ref[...].astype(jnp.float32)                  # (C, TN) lane-dense
    tgt = tgt_ref[...]                                      # (1, TN) int32

    # log-softmax pieces along the class (sublane) axis.
    # TODO(synk): on v7x the single EUP slot (18 f32 exps per 72 B) can become
    # co-binding with 3.2 TB/s HBM; exp in bf16 would ~double EUP throughput at
    # ~1e-3 accuracy.  Kept f32 here to preserve the 1e-5 reference tolerance.
    m = jnp.max(x, axis=0, keepdims=True)                   # (1, TN)
    shifted = x - m                                         # (C, TN)
    lse = jnp.log(jnp.sum(jnp.exp(shifted), axis=0, keepdims=True))   # (1, TN)

    # Algebraic simplification (no materialized true_dist, no full-width mul):
    #   sum_c(true_dist * logp) = smooth_val * sum_c(logp)
    #                             + (confidence - smooth_val) * logp[target]
    #   sum_c(logp)  = sum_c(shifted) - C * lse
    #   logp[target] = shifted[target] - lse
    sum_shifted = jnp.sum(shifted, axis=0, keepdims=True)              # (1, TN)
    cls_ids = jax.lax.broadcasted_iota(jnp.int32, x.shape, 0)          # (C, TN)
    shifted_tgt = jnp.sum(jnp.where(cls_ids == tgt, shifted, 0.0),
                          axis=0, keepdims=True)                        # (1, TN)

    sum_logp = sum_shifted - jnp.float32(num_classes) * lse
    logp_tgt = shifted_tgt - lse
    col_loss = -(jnp.float32(smooth_val) * sum_logp
                 + jnp.float32(confidence - smooth_val) * logp_tgt)     # (1, TN)

    # Mask the ragged last block (and any fully-out-of-range step whose
    # index_map was clamped): garbage columns produce finite/NaN values that
    # are *selected* away, never multiplied in, so correctness is preserved.
    col0 = (p * steps + j) * tile_n
    col_ids = col0 + jax.lax.broadcasted_iota(jnp.int32, (1, tile_n), 1)
    col_loss = jnp.where(col_ids < total_n, col_loss, 0.0)

    # Per-column accumulation (lane-dense output block -> unmasked vst);
    # the final scalar reduce happens once in the wrapper on a tiny array.
    out_ref[...] = out_ref[...] + col_loss[None]


def label_smoothing_loss(pred, target, *, classes=18, smoothing=0.5,
                         tile_n=None, n_split=None):
    """Pallas equivalent of LabelSmoothingLoss.forward (returns a scalar)."""
    n, c = pred.shape
    assert c == classes
    confidence = 1.0 - smoothing
    smooth_val = smoothing / (classes - 1)

    # Lane-dense tile width: multiple of 128, clamped to the problem size.
    if tile_n is None:
        tile_n = _default_tile_n()
    tile_n = max(128, min(int(tile_n), ((n + 127) // 128) * 128))
    tile_n = ((tile_n + 127) // 128) * 128

    nb = pl.cdiv(n, tile_n)                     # number of column blocks
    if n_split is None:
        n_split = _num_tensorcores()
    n_split = max(1, min(int(n_split), nb))
    steps = pl.cdiv(nb, n_split)

    # Class-major / lane-dense layout.  Single transpose pass, no pad copy.
    # TODO(synk): if the producer can emit class-major activations directly,
    # this transpose (one extra HBM pass on a memory-bound op) disappears.
    pred_t = pred.astype(jnp.float32).T                     # (C, N)
    tgt2d = target.astype(jnp.int32).reshape(1, n)          # (1, N)
    # (target could be shipped as int8 for ~4% less HBM traffic; kept int32
    #  for maximally robust lowering since the win is marginal.)

    kernel = functools.partial(
        _label_smoothing_kernel,
        confidence=confidence,
        smooth_val=smooth_val,
        num_classes=classes,
        total_n=n,
        tile_n=tile_n,
    )

    last_block = nb - 1

    def in_idx(p, j):
        # Clamp overflow steps (when nb is not divisible by n_split) onto the
        # last valid block; the kernel's logical-column mask zeroes them out.
        return (0, jnp.minimum(p * steps + j, last_block))

    partials = pl.pallas_call(
        kernel,
        out_shape=jax.ShapeDtypeStruct((n_split, 1, tile_n), jnp.float32),
        grid_spec=pltpu.PrefetchScalarGridSpec(
            num_scalar_prefetch=0,
            grid=(n_split, steps),
            in_specs=[
                pl.BlockSpec((classes, tile_n), in_idx),
                pl.BlockSpec((1, tile_n), in_idx),
            ],
            out_specs=pl.BlockSpec((1, 1, tile_n), lambda p, j: (p, 0, 0)),
        ),
        compiler_params=pltpu.CompilerParams(
            dimension_semantics=("parallel", "arbitrary")),
    )(pred_t, tgt2d)

    return jnp.sum(partials) / jnp.float32(n)


def _reference(pred, target, *, classes=18, smoothing=0.5):
    confidence = 1.0 - smoothing
    logp = jax.nn.log_softmax(pred.astype(jnp.float32), axis=-1)
    true_dist = jnp.full_like(logp, smoothing / (classes - 1))
    true_dist = true_dist.at[jnp.arange(pred.shape[0]), target].set(confidence)
    return jnp.mean(jnp.sum(-true_dist * logp, axis=-1))


if __name__ == "__main__":
    key = jax.random.PRNGKey(0)
    k1, k2 = jax.random.split(key)

    # 1) tiny shape consistent with the module (N=16 rows, 18 classes)
    N, C = 16, 18
    pred = jax.random.normal(k1, (N, C), dtype=jnp.float32)
    target = jax.random.randint(k2, (N,), 0, C, dtype=jnp.int32)
    loss = jax.block_until_ready(label_smoothing_loss(pred, target, classes=C, smoothing=0.5))
    ref = _reference(pred, target, classes=C, smoothing=0.5)
    assert jnp.allclose(loss, ref, atol=1e-5, rtol=1e-5), (loss, ref)

    # 2) multi-tile, non-divisible N (ragged last block, accumulation over steps)
    N2 = 16 * 128 + 37
    p2 = jax.random.normal(k1, (N2, C), dtype=jnp.float32)
    t2 = jax.random.randint(k2, (N2,), 0, C, dtype=jnp.int32)
    loss2 = jax.block_until_ready(
        label_smoothing_loss(p2, t2, classes=C, smoothing=0.5, tile_n=1024))
    ref2 = _reference(p2, t2, classes=C, smoothing=0.5)
    assert jnp.allclose(loss2, ref2, atol=1e-5, rtol=1e-5), (loss2, ref2)

    # 3) force the 2-partial path (dual-TC layout + clamped overflow step);
    #    on single-TC chips it simply serializes, so it validates everywhere.
    loss3 = jax.block_until_ready(
        label_smoothing_loss(p2, t2, classes=C, smoothing=0.5, tile_n=512, n_split=2))
    assert jnp.allclose(loss3, ref2, atol=1e-5, rtol=1e-5), (loss3, ref2)

    print("KERNEL_OK")
</pallas_src>

<mosaic_0001>
module attributes {stable_mosaic.version = 11 : i64} {
  func.func @_label_smoothing_kernel(%arg0: i32, %arg1: i32, %arg2: memref<18x128xf32, #tpu.memory_space<vmem>>, %arg3: memref<1x128xi32, #tpu.memory_space<vmem>>, %arg4: memref<1x1x128xf32, #tpu.memory_space<vmem>>) attributes {dimension_semantics = [#tpu.dimension_semantics<parallel>, #tpu.dimension_semantics<arbitrary>], iteration_bounds = array<i64: 1, 1>, scalar_prefetch = 0 : i64, scratch_operands = 0 : i64, tpu.core_type = #tpu.core_type<tc>, window_params = [{transform_indices = @transform_0, window_bounds = array<i64: 18, 128>}, {transform_indices = @transform_1, window_bounds = array<i64: 1, 128>}, {transform_indices = @transform_2, window_bounds = array<i64: 1, 1, 128>}]} {
    %c0_i32 = arith.constant 0 : i32
    %0 = arith.cmpi eq, %arg1, %c0_i32 : i32
    %1 = arith.extui %0 : i1 to i32
    %c0_i32_0 = arith.constant 0 : i32
    %2 = arith.cmpi ne, %1, %c0_i32_0 : i32
    scf.if %2 {
      %cst_19 = arith.constant 0.000000e+00 : f32
      %47 = vector.broadcast %cst_19 : f32 to vector<1x1x128xf32>
      %c0_20 = arith.constant 0 : index
      %c0_21 = arith.constant 0 : index
      %c0_22 = arith.constant 0 : index
      %48 = vector.load %arg4[%c0_20, %c0_21, %c0_22] : memref<1x1x128xf32, #tpu.memory_space<vmem>>, vector<1x1x128xf32>
      tpu.vector_store %arg4[%c0_20, %c0_21, %c0_22], %47 {strides = array<i32>} : memref<1x1x128xf32, #tpu.memory_space<vmem>>, vector<1x1x128xf32>,
    } else {
    }
    %c0 = arith.constant 0 : index
    %c0_1 = arith.constant 0 : index
    %3 = vector.load %arg2[%c0, %c0_1] : memref<18x128xf32, #tpu.memory_space<vmem>>, vector<18x128xf32>
    %c0_2 = arith.constant 0 : index
    %c0_3 = arith.constant 0 : index
    %4 = vector.load %arg3[%c0_2, %c0_3] : memref<1x128xi32, #tpu.memory_space<vmem>>, vector<1x128xi32>
    %cst = arith.constant dense<0xFF800000> : vector<128xf32>
    %5 = vector.multi_reduction <maximumf>, %3, %cst [0] : vector<18x128xf32> to vector<128xf32>
    %6 = vector.shape_cast %5 : vector<128xf32> to vector<1x128xf32>
    %7 = vector.broadcast %6 : vector<1x128xf32> to vector<18x128xf32>
    %8 = arith.subf %3, %7 : vector<18x128xf32>
    %9 = math.exp %8 : vector<18x128xf32>
    %cst_4 = arith.constant dense<0.000000e+00> : vector<128xf32>
    %10 = vector.multi_reduction <add>, %9, %cst_4 [0] : vector<18x128xf32> to vector<128xf32>
    %11 = vector.shape_cast %10 : vector<128xf32> to vector<1x128xf32>
    %12 = math.log %11 : vector<1x128xf32>
    %cst_5 = arith.constant dense<0.000000e+00> : vector<128xf32>
    %13 = vector.multi_reduction <add>, %8, %cst_5 [0] : vector<18x128xf32> to vector<128xf32>
    %14 = vector.shape_cast %13 : vector<128xf32> to vector<1x128xf32>
    %15 = tpu.iota {dimensions = array<i32: 0>} : vector<18x128xi32>
    %16 = vector.broadcast %4 : vector<1x128xi32> to vector<18x128xi32>
    %17 = arith.cmpi eq, %15, %16 : vector<18x128xi32>
    %cst_6 = arith.constant 0.000000e+00 : f32
    %18 = vector.broadcast %cst_6 : f32 to vector<18x128xf32>
    %19 = arith.select %17, %8, %18 : vector<18x128xi1>, vector<18x128xf32>
    %cst_7 = arith.constant dense<0.000000e+00> : vector<128xf32>
    %20 = vector.multi_reduction <add>, %19, %cst_7 [0] : vector<18x128xf32> to vector<128xf32>
    %21 = vector.shape_cast %20 : vector<128xf32> to vector<1x128xf32>
    %cst_8 = arith.constant 1.800000e+01 : f32
    %22 = vector.broadcast %cst_8 : f32 to vector<1x128xf32>
    %23 = arith.mulf %22, %12 : vector<1x128xf32>
    %24 = arith.subf %14, %23 : vector<1x128xf32>
    %25 = arith.subf %21, %12 : vector<1x128xf32>
    %cst_9 = arith.constant 0.0294117648 : f32
    %26 = vector.broadcast %cst_9 : f32 to vector<1x128xf32>
    %27 = arith.mulf %26, %24 : vector<1x128xf32>
    %cst_10 = arith.constant 0.470588237 : f32
    %28 = vector.broadcast %cst_10 : f32 to vector<1x128xf32>
    %29 = arith.mulf %28, %25 : vector<1x128xf32>
    %30 = arith.addf %27, %29 : vector<1x128xf32>
    %cst_11 = arith.constant 0.000000e+00 : f32
    %31 = vector.broadcast %cst_11 : f32 to vector<1x128xf32>
    %32 = arith.subf %31, %30 : vector<1x128xf32>
    %c1_i32 = arith.constant 1 : i32
    %33 = arith.muli %arg0, %c1_i32 : i32
    %34 = arith.addi %33, %arg1 : i32
    %c128_i32 = arith.constant 128 : i32
    %35 = arith.muli %34, %c128_i32 : i32
    %36 = tpu.iota {dimensions = array<i32: 1>} : vector<1x128xi32>
    %37 = vector.broadcast %35 : i32 to vector<1x128xi32>
    %38 = arith.addi %37, %36 : vector<1x128xi32>
    %c16_i32 = arith.constant 16 : i32
    %39 = vector.broadcast %c16_i32 : i32 to vector<1x128xi32>
    %40 = arith.cmpi slt, %38, %39 : vector<1x128xi32>
    %cst_12 = arith.constant 0.000000e+00 : f32
    %41 = vector.broadcast %cst_12 : f32 to vector<1x128xf32>
    %42 = arith.select %40, %32, %41 : vector<1x128xi1>, vector<1x128xf32>
    %c0_13 = arith.constant 0 : index
    %c0_14 = arith.constant 0 : index
    %c0_15 = arith.constant 0 : index
    %43 = vector.load %arg4[%c0_13, %c0_14, %c0_15] : memref<1x1x128xf32, #tpu.memory_space<vmem>>, vector<1x1x128xf32>
    %44 = vector.shape_cast %42 : vector<1x128xf32> to vector<1x1x128xf32>
    %45 = arith.addf %43, %44 : vector<1x1x128xf32>
    %c0_16 = arith.constant 0 : index
    %c0_17 = arith.constant 0 : index
    %c0_18 = arith.constant 0 : index
    %46 = vector.load %arg4[%c0_16, %c0_17, %c0_18] : memref<1x1x128xf32, #tpu.memory_space<vmem>>, vector<1x1x128xf32>
    tpu.vector_store %arg4[%c0_16, %c0_17, %c0_18], %45 {strides = array<i32>} : memref<1x1x128xf32, #tpu.memory_space<vmem>>, vector<1x1x128xf32>,
    return
  }
  func.func @transform_0(%arg0: i32, %arg1: i32) -> (i32, i32) {
    %c1_i32 = arith.constant 1 : i32
    %0 = arith.muli %arg0, %c1_i32 : i32
    %1 = arith.addi %0, %arg1 : i32
    %c0_i32 = arith.constant 0 : i32
    %2 = arith.minsi %1, %c0_i32 : i32
    %c0_i32_0 = arith.constant 0 : i32
    %c0_i32_1 = arith.constant 0 : i32
    return %c0_i32_0, %2 : i32, i32
  }
  func.func @transform_1(%arg0: i32, %arg1: i32) -> (i32, i32) {
    %c1_i32 = arith.constant 1 : i32
    %0 = arith.muli %arg0, %c1_i32 : i32
    %1 = arith.addi %0, %arg1 : i32
    %c0_i32 = arith.constant 0 : i32
    %2 = arith.minsi %1, %c0_i32 : i32
    %c0_i32_0 = arith.constant 0 : i32
    %c0_i32_1 = arith.constant 0 : i32
    return %c0_i32_0, %2 : i32, i32
  }
  func.func @transform_2(%arg0: i32, %arg1: i32) -> (i32, i32, i32) {
    %c0_i32 = arith.constant 0 : i32
    %c0_i32_0 = arith.constant 0 : i32
    %c0_i32_1 = arith.constant 0 : i32
    return %arg0, %c0_i32, %c0_i32_0 : i32, i32, i32
  }
}

</mosaic_0001>

<bundles_post_ra>
// kernel: tpu_custom_call.1
= control target key start
LH: loop header
LB: loop body
LE: loop exit
PB: predicated region body
PF: predicated region fallthrough
CT: control target
= control target key end

     0   :  { %vm72_vm0 = vcmask 1041408   ;;  %v210_v3 = vmov 0.0   ;;  %s255_s0 = inlined_call_operand.vmem [shape: f32[18,16], index: 0, kind: input, shape index: {}]   ;;  %s256_s1 = inlined_call_operand.vmem [shape: s32[1,16], index: 1, kind: input, shape index: {}]   ;;  %s257_s2 = inlined_call_operand.hbm [shape: f32[1,1,128], index: 2, kind: output, shape index: {}]  }
   0x1   :  { %v68_v0 = vld [vmem:[%s255_s0] sm:$0xff]  ;;  %v69_v1 = vld [vmem:[%s255_s0 + $0x8] sm:$0xff]  ;;  %v70_v2 = vld [vmem:[%s255_s0 + $0x10] sm:$0x3]  ;;  %67 = vst [vmem:[#allocation2] sm:$0x1] %v210_v3 }
   0x2   :  { %v73_v4 = vsel %vm72_vm0, %v70_v2, -inf  ;;  %v74_v5 = vmax.f32 %v68_v0, %v69_v1 }
   0x3   :  { %7 = vsyncpa [#allocation3], 0  ;;  %v111_v11 = vlaneseq  ;;  %v175_v22 = vld [vmem:[%s256_s1] ss:$0 sm:$0xff]  ;;  %s211_s1 = smov [#allocation2]  }
   0x4   :  { %v75_v6 = vmax.f32 %v74_v5, %v73_v4  ;;  %s158_s16 = sshll.u32 %s211_s1, 4  ;;  %s159_s16 = int_to_ptr.vmem [resolvable:$true] %s158_s16 }
   0x5   :  { %v112_v14 = vshrl.u32 %v111_v11, 7  ;;  %v144_v63 = vand.u32 127, %v111_v11  ;;  %s186_s17 = scalar_lea.vmem %s159_s16, 16  ;;  %s190_s18 = scalar_lea.vmem %s159_s16, 32 }
   0x6   :  { %v76_v7 = vrot.slane %v75_v6, 4  ;;  %p187_p0 = scmp.ne.s32.totalorder %s159_s16, %s186_s17  ;;  %p191_p1 = scmp.lt.s32.totalorder %s159_s16, %s159_s16 }
   0x7   :  { %v113_v21 = vadd.s32 8, %v112_v14  ;;  %v114_v23 = vadd.s32 16, %v112_v14  ;;  %vm119_vm1 = vcmp.eq.s32.totalorder %v112_v14, %v175_v22  ;;  %vm147_vm4 = vcmp.lt.s32.totalorder %v144_v63, 16  ;;  %p192_p2 = scmp.lt.s32.totalorder %s190_s18, %s186_s17 }
   0x8   :  { %v77_v8 = vmax.f32 %v75_v6, %v76_v7  ;;  %v149_v3 = vld [vmem:[#allocation2] sm:$0x1] }
   0x9   :  { %vm120_vm2 = vcmp.eq.s32.totalorder %v113_v21, %v175_v22  ;;  %vm121_vm3 = vcmp.eq.s32.totalorder %v114_v23, %v175_v22  ;;  %p193_p3 = por %p192_p2, %p191_p1 }
   0xa   :  { %v78_v9 = vrot.slane %v77_v8, 2 }
   0xb   :  { %p194_p4 = pnand %p193_p3, %p187_p0 }
   0xc   :  { %v79_v10 = vmax.f32 %v77_v8, %v78_v9 }
   0xe   :  { %v80_v12 = vrot.slane %v79_v10, 1 }
  0x10   :  { %v81_v13 = vmax.f32 %v79_v10, %v80_v12 }
  0x12   :  { %v82_v15 = vsub.f32 %v68_v0, %v81_v13  ;;  %v83_v16 = vsub.f32 %v69_v1, %v81_v13  ;;  %v84_v17 = vsub.f32 %v70_v2, %v81_v13 }
  0x14   :  { %v85_v18 = vmul.f32 1.442695, %v82_v15  ;;  %v87_v19 = vmul.f32 1.442695, %v83_v16  ;;  %v89_v20 = vmul.f32 1.442695, %v84_v17  ;;  %v102_v31 = vadd.f32 %v83_v16, %v82_v15 }
  0x15   :  { %v122_v24 = vsel %vm119_vm1, %v82_v15, 0.0  ;;  %v123_v25 = vsel %vm120_vm2, %v83_v16, 0.0  ;;  %v124_v26 = vsel %vm121_vm3, %v84_v17, 0.0  ;;  %v103_v34 = vsel %vm72_vm0, %v84_v17, 0.0 }
  0x16   :  { %178 = vpow2.f32 %v85_v18  ;;  %v125_v27 = vadd.f32 %v123_v25, %v122_v24  ;;  %v126_v29 = vsel %vm72_vm0, %v124_v26, 0.0  ;;  %v104_v38 = vadd.f32 %v103_v34, %v102_v31 }
  0x17   :  { %180 = vpow2.f32 %v87_v19 }
  0x18   :  { %182 = vpow2.f32 %v89_v20  ;;  %v127_v36 = vadd.f32 %v126_v29, %v125_v27  ;;  %v105_v42 = vrot.slane %v104_v38, 4 }
  0x1a   :  { %v128_v40 = vrot.slane %v127_v36, 4  ;;  %v106_v46 = vadd.f32 %v105_v42, %v104_v38 }
  0x1c   :  { %v129_v44 = vadd.f32 %v128_v40, %v127_v36  ;;  %v107_v50 = vrot.slane %v106_v46, 2 }
  0x1e   :  { %v130_v48 = vrot.slane %v129_v44, 2  ;;  %v108_v52 = vadd.f32 %v107_v50, %v106_v46 }
  0x20   :  { %v179_v28 = vpop.eup %178  ;;  %v131_v51 = vadd.f32 %v130_v48, %v129_v44  ;;  %v109_v54 = vrot.slane %v108_v52, 1 }
  0x21   :  { %v181_v30 = vpop.eup %180 }
  0x22   :  { %v183_v32 = vpop.eup %182  ;;  %v91_v33 = vadd.f32 %v181_v30, %v179_v28  ;;  %v132_v53 = vrot.slane %v131_v51, 1  ;;  %v110_v58 = vadd.f32 %v109_v54, %v108_v52 }
  0x23   :  { %v92_v35 = vsel %vm72_vm0, %v183_v32, 0.0 }
  0x24   :  { %v93_v37 = vadd.f32 %v92_v35, %v91_v33  ;;  %v133_v55 = vadd.f32 %v132_v53, %v131_v51 }
  0x26   :  { %v94_v39 = vrot.slane %v93_v37, 4 }
  0x28   :  { %v95_v41 = vadd.f32 %v94_v39, %v93_v37 }
  0x2a   :  { %v96_v43 = vrot.slane %v95_v41, 2 }
  0x2c   :  { %v97_v45 = vadd.f32 %v96_v43, %v95_v41 }
  0x2e   :  { %v98_v47 = vrot.slane %v97_v45, 1 }
  0x30   :  { %v99_v49 = vadd.f32 %v98_v47, %v97_v45 }
  0x32   :  { %184 = vlog2.f32 %v99_v49 }
  0x3c   :  { %v185_v56 = vpop.eup %184 }
  0x3d   :  { %v101_v57 = vmul.f32 0.6931472, %v185_v56 }
  0x3f   :  { %v134_v59 = vmul.f32 18.0, %v101_v57  ;;  %v136_v60 = vsub.f32 %v133_v55, %v101_v57 }
  0x41   :  { %v135_v61 = vsub.f32 %v110_v58, %v134_v59  ;;  %v138_v62 = vmul.f32 0.47058824, %v136_v60 }
  0x43   :  { %v137_v0 = vmul.f32 0.029411765, %v135_v61 }
  0x45   :  { %v139_v1 = vadd.f32 %v138_v62, %v137_v0 }
  0x47   :  { %v140_v2 = vsub.f32 0.0, %v139_v1 }
  0x49   :  { %v148_v4 = vsel %vm147_vm4, %v140_v2, 0.0 }
  0x4a   :  { %v150_v5 = vadd.f32 %v149_v3, %v148_v4 }
  0x4c   :  { %151 = vst [vmem:[#allocation2] sm:$0x1] %v150_v5 }
  0x4d   :  { %197 = shalt.err (!%p194_p4)
}
  0x4e   :  { %s198_s21 = scalar_lea.hbm %s257_s2, 16 }
  0x4f   :  { %p199_p5 = scmp.ne.s32.totalorder %s257_s2, %s198_s21  ;;  %p202_p6 = scmp.lt.u32.totalorder %s198_s21, %s257_s2 }
  0x51   :  { %p204_p7 = pnand %p202_p6, %p199_p5 }
  0x53   :  { %207 = shalt.err (!%p204_p7)
}
  0x54   :  { %161 = dma.vmem_to_hbm [thread:$0]  %s159_s16, 16, %s257_s2, [#allocation3]  }
  0x55   :  { %208 = dma.done.wait [#allocation3], 16  }
  0x56   :  { %209 = vsyncadd [#allocation3], 4294967280 }
  0x57   :  { %165 = vsyncpa [#allocation3], 1 }

</bundles_post_ra>
